<compile_context>
chip_gen: v5e
topology: v5e:2x2
jax: 0.10.0
libtpu: 0.0.40
codegen_flags: <defaults>
</compile_context>

<pallas_src>
import jax
import jax.numpy as jnp
from jax import lax
from jax.experimental import pallas as pl
from jax.experimental.pallas import tpu as pltpu


def _cepstral_norm_kernel(y_ref, gamma_ref, beta_ref, o_ref):
    # y_ref: (TN, K)   gamma_ref/beta_ref: (TN, 1)   o_ref: (TN, K)
    # TODO(synk): for bf16 inputs on v6e/v7x, skip the f32 tile copy and do the
    # final FMA in bf16 (f32-accumulating reductions only) to halve vreg/VMEM.
    y32 = y_ref[...].astype(jnp.float32)
    inv_k = jnp.float32(1.0 / y32.shape[-1])

    # Pass 1: mean.  Pass 2: variance around the mean (two-pass, numerically
    # safe vs E[y^2]-mean^2; the tile is already in VMEM so this is free).
    mean = jnp.sum(y32, axis=-1, keepdims=True) * inv_k          # (TN, 1)
    diff = y32 - mean
    var = jnp.sum(diff * diff, axis=-1, keepdims=True) * inv_k   # (TN, 1)
    inv_std = lax.rsqrt(var + jnp.float32(1e-7))                 # EUP, per row

    g = gamma_ref[...].astype(jnp.float32)                       # (TN, 1)
    b = beta_ref[...].astype(jnp.float32)                        # (TN, 1)
    scale = g * inv_std                                          # (TN, 1)
    shift = b - mean * scale                                     # (TN, 1)

    # Per-element cost: one mul + one add.
    o_ref[...] = (y32 * scale + shift).astype(o_ref.dtype)


def _vmem_budget_and_limit():
    """Generation-aware (tile_budget_bytes, vmem_limit_bytes)."""
    cap = None
    try:
        info = pltpu.get_tpu_info()
        cap = getattr(info, "vmem_capacity_bytes", None)
    except Exception:
        cap = None
    if cap is None:
        cap = 64 * 1024 * 1024  # conservative default (v7x-sized)
    if cap >= 128 * 1024 * 1024:        # v5e / v6e: 128 MiB physical VMEM
        return 52 * 1024 * 1024, 104 * 1024 * 1024
    else:                               # v7x: 64 MiB physical VMEM
        return 20 * 1024 * 1024, 46 * 1024 * 1024


def _choose_channel_tile(n, k, itemsize, vmem_tile_budget, min_n_blocks):
    """Largest channel tile (multiple of 8, divisor of N) fitting the budget,
    then shrunk (if possible) until the channel axis yields min_n_blocks."""
    k_lanes = -(-k // 128) * 128  # lane padding of the K axis inside VMEM
    # Per channel row: 2x double-buffered input + 2x double-buffered output
    # tiles (native dtype) + ~1 f32 working copy, plus the lane-padded
    # gamma/beta blocks (2 params x 2 buffers x 128 lanes x f32 = 2 KiB/row).
    bytes_per_row = k_lanes * (4 * itemsize + 4) + 4 * 128 * 4

    if n % 8 != 0:
        # Full-axis block satisfies the (8,128) rule even if N % 8 != 0.
        # TODO(synk): pad the channel axis to a multiple of 8 (gamma=1, beta=0)
        # if a full-N block ever exceeds the VMEM budget for huge N*K.
        return n

    max_rows = vmem_tile_budget // bytes_per_row
    tn = min(n, (max_rows // 8) * 8)
    if tn < 8:
        # TODO(synk): for extremely long K add a K grid axis ("arbitrary") with
        # sum/sumsq accumulation in VMEM scratch + a second normalization
        # sweep; fall back to the smallest legal tile for now.
        tn = 8
    while n % tn != 0:        # avoid padded edge blocks on the channel axis
        tn -= 8

    # Guarantee >= min_n_blocks channel blocks (feeds both v7x TensorCores
    # when the batch axis alone cannot).
    while (n // tn) < min_n_blocks and tn > 8:
        cand = tn - 8
        while cand >= 8 and n % cand != 0:
            cand -= 8
        if cand < 8:
            break
        tn = cand
    return tn


def cepstral_norm(y, gamma, beta):
    """y: [M, N, K], gamma/beta: [1, N, 1] -> [M, N, K] (gLN over length)."""
    M, N, K = y.shape
    itemsize = jnp.dtype(y.dtype).itemsize

    tile_budget, vmem_limit = _vmem_budget_and_limit()
    # With M >= 2 the batch axis already provides >= 2 grid blocks.
    min_n_blocks = 1 if M >= 2 else 2
    tn = _choose_channel_tile(N, K, itemsize, tile_budget, min_n_blocks)

    # Batch axis innermost: gamma/beta block index is constant across it, so
    # Pallas re-uses the resident param tiles instead of re-DMAing them.
    grid = (N // tn, M)

    out = pl.pallas_call(
        _cepstral_norm_kernel,
        out_shape=jax.ShapeDtypeStruct((M, N, K), y.dtype),
        grid_spec=pltpu.PrefetchScalarGridSpec(
            num_scalar_prefetch=0,
            grid=grid,
            in_specs=[
                pl.BlockSpec((pl.Squeezed(), tn, K), lambda n, m: (m, n, 0)),
                pl.BlockSpec((pl.Squeezed(), tn, 1), lambda n, m: (0, n, 0)),
                pl.BlockSpec((pl.Squeezed(), tn, 1), lambda n, m: (0, n, 0)),
            ],
            out_specs=pl.BlockSpec((pl.Squeezed(), tn, K),
                                   lambda n, m: (m, n, 0)),
        ),
        compiler_params=pltpu.CompilerParams(
            dimension_semantics=("parallel", "parallel"),
            vmem_limit_bytes=vmem_limit,
        ),
    )(y, gamma, beta)
    return out


def cepstral_norm_ref(y, gamma, beta):
    mean = jnp.mean(y, axis=2, keepdims=True)
    var = jnp.mean((y - mean) ** 2, axis=2, keepdims=True)
    return gamma * (y - mean) / jnp.sqrt(var + 1e-7) + beta


if __name__ == "__main__":
    key = jax.random.PRNGKey(0)
    M, N, K = 2, 4, 16                       # batch, channel, length
    y = jax.random.normal(key, (M, N, K), dtype=jnp.float32)

    # Deterministic parameter init, matching reset_parameters():
    gamma = jnp.ones((1, N, 1), dtype=jnp.float32)
    beta = jnp.zeros((1, N, 1), dtype=jnp.float32)

    out = cepstral_norm(y, gamma, beta)
    out = jax.block_until_ready(out)

    ref = cepstral_norm_ref(y, gamma, beta)
    assert out.shape == (M, N, K)
    assert jnp.allclose(out, ref, atol=1e-5, rtol=1e-5), "mismatch vs reference"

    print("KERNEL_OK")
</pallas_src>

<mosaic_0001>
module attributes {stable_mosaic.version = 11 : i64} {
  func.func @_cepstral_norm_kernel(%arg0: i32, %arg1: i32, %arg2: memref<1x4x16xf32, #tpu.memory_space<vmem>>, %arg3: memref<1x4x1xf32, #tpu.memory_space<vmem>>, %arg4: memref<1x4x1xf32, #tpu.memory_space<vmem>>, %arg5: memref<1x4x16xf32, #tpu.memory_space<vmem>>) attributes {dimension_semantics = [#tpu.dimension_semantics<parallel>, #tpu.dimension_semantics<parallel>], iteration_bounds = array<i64: 1, 2>, scalar_prefetch = 0 : i64, scratch_operands = 0 : i64, tpu.core_type = #tpu.core_type<tc>, window_params = [{transform_indices = @transform_0, window_bounds = array<i64: 1, 4, 16>}, {transform_indices = @transform_1, window_bounds = array<i64: 1, 4, 1>}, {transform_indices = @transform_2, window_bounds = array<i64: 1, 4, 1>}, {transform_indices = @transform_3, window_bounds = array<i64: 1, 4, 16>}]} {
    %c0 = arith.constant 0 : index
    %c0_0 = arith.constant 0 : index
    %c0_1 = arith.constant 0 : index
    %0 = vector.load %arg2[%c0, %c0_0, %c0_1] : memref<1x4x16xf32, #tpu.memory_space<vmem>>, vector<1x4x16xf32>
    %1 = vector.shape_cast %0 : vector<1x4x16xf32> to vector<4x16xf32>
    %cst = arith.constant dense<0.000000e+00> : vector<4xf32>
    %2 = vector.multi_reduction <add>, %1, %cst [1] : vector<4x16xf32> to vector<4xf32>
    %3 = vector.shape_cast %2 : vector<4xf32> to vector<4x1xf32>
    %cst_2 = arith.constant 6.250000e-02 : f32
    %4 = vector.broadcast %cst_2 : f32 to vector<4x1xf32>
    %5 = arith.mulf %3, %4 : vector<4x1xf32>
    %6 = vector.broadcast %5 : vector<4x1xf32> to vector<4x16xf32>
    %7 = arith.subf %1, %6 : vector<4x16xf32>
    %8 = arith.mulf %7, %7 : vector<4x16xf32>
    %cst_3 = arith.constant dense<0.000000e+00> : vector<4xf32>
    %9 = vector.multi_reduction <add>, %8, %cst_3 [1] : vector<4x16xf32> to vector<4xf32>
    %10 = vector.shape_cast %9 : vector<4xf32> to vector<4x1xf32>
    %cst_4 = arith.constant 6.250000e-02 : f32
    %11 = vector.broadcast %cst_4 : f32 to vector<4x1xf32>
    %12 = arith.mulf %10, %11 : vector<4x1xf32>
    %cst_5 = arith.constant 1.000000e-07 : f32
    %13 = vector.broadcast %cst_5 : f32 to vector<4x1xf32>
    %14 = arith.addf %12, %13 : vector<4x1xf32>
    %15 = math.rsqrt %14 : vector<4x1xf32>
    %c0_6 = arith.constant 0 : index
    %c0_7 = arith.constant 0 : index
    %c0_8 = arith.constant 0 : index
    %16 = vector.load %arg3[%c0_6, %c0_7, %c0_8] : memref<1x4x1xf32, #tpu.memory_space<vmem>>, vector<1x4x1xf32>
    %17 = vector.shape_cast %16 : vector<1x4x1xf32> to vector<4x1xf32>
    %c0_9 = arith.constant 0 : index
    %c0_10 = arith.constant 0 : index
    %c0_11 = arith.constant 0 : index
    %18 = vector.load %arg4[%c0_9, %c0_10, %c0_11] : memref<1x4x1xf32, #tpu.memory_space<vmem>>, vector<1x4x1xf32>
    %19 = vector.shape_cast %18 : vector<1x4x1xf32> to vector<4x1xf32>
    %20 = arith.mulf %17, %15 : vector<4x1xf32>
    %21 = arith.mulf %5, %20 : vector<4x1xf32>
    %22 = arith.subf %19, %21 : vector<4x1xf32>
    %23 = vector.broadcast %20 : vector<4x1xf32> to vector<4x16xf32>
    %24 = arith.mulf %1, %23 : vector<4x16xf32>
    %25 = vector.broadcast %22 : vector<4x1xf32> to vector<4x16xf32>
    %26 = arith.addf %24, %25 : vector<4x16xf32>
    %c0_12 = arith.constant 0 : index
    %c0_13 = arith.constant 0 : index
    %c0_14 = arith.constant 0 : index
    %27 = vector.load %arg5[%c0_12, %c0_13, %c0_14] : memref<1x4x16xf32, #tpu.memory_space<vmem>>, vector<1x4x16xf32>
    %28 = vector.shape_cast %27 : vector<1x4x16xf32> to vector<4x16xf32>
    %29 = vector.shape_cast %26 : vector<4x16xf32> to vector<1x4x16xf32>
    tpu.vector_store %arg5[%c0_12, %c0_13, %c0_14], %29 {strides = array<i32>} : memref<1x4x16xf32, #tpu.memory_space<vmem>>, vector<1x4x16xf32>,
    return
  }
  func.func @transform_0(%arg0: i32, %arg1: i32) -> (i32, i32, i32) {
    %c0_i32 = arith.constant 0 : i32
    %c0_i32_0 = arith.constant 0 : i32
    return %arg1, %arg0, %c0_i32 : i32, i32, i32
  }
  func.func @transform_1(%arg0: i32, %arg1: i32) -> (i32, i32, i32) {
    %c0_i32 = arith.constant 0 : i32
    %c0_i32_0 = arith.constant 0 : i32
    %c0_i32_1 = arith.constant 0 : i32
    return %c0_i32, %arg0, %c0_i32_0 : i32, i32, i32
  }
  func.func @transform_2(%arg0: i32, %arg1: i32) -> (i32, i32, i32) {
    %c0_i32 = arith.constant 0 : i32
    %c0_i32_0 = arith.constant 0 : i32
    %c0_i32_1 = arith.constant 0 : i32
    return %c0_i32, %arg0, %c0_i32_0 : i32, i32, i32
  }
  func.func @transform_3(%arg0: i32, %arg1: i32) -> (i32, i32, i32) {
    %c0_i32 = arith.constant 0 : i32
    %c0_i32_0 = arith.constant 0 : i32
    return %arg1, %arg0, %c0_i32 : i32, i32, i32
  }
}

</mosaic_0001>

<bundles_post_ra>
// kernel: tpu_custom_call.1
= control target key start
LH: loop header
LB: loop body
LE: loop exit
PB: predicated region body
PF: predicated region fallthrough
CT: control target
= control target key end

     0   :  { %8 = vsyncpa [#allocation3], 0  ;;  %s664_s0 = inlined_call_operand.vmem [shape: f32[2,4,16], index: 0, kind: input, shape index: {}]   ;;  %s665_s1 = inlined_call_operand.vmem [shape: f32[1,4,1], index: 1, kind: input, shape index: {}]   ;;  %s666_s2 = inlined_call_operand.vmem [shape: f32[1,4,1], index: 2, kind: input, shape index: {}]   ;;  %s667_s3 = inlined_call_operand.hbm [shape: f32[2,4,16], index: 3, kind: output, shape index: {}]  }
   0x1   :  { %10 = vsyncpa [#allocation3 + $0x1], 0  ;;  %s558_s12 = smov 0   ;;  %s560_s13 = smov 0  }
   0x2   :  { %s562_s14 = smov 0   ;;  %s564_s15 = smov 0  }
   0x3   :  { %s566_s16 = smov 0   ;;  %s568_s17 = smov 0  }
   0x4 LB: > { %s384_s18 = sadd.s32 4294967295, %s535_s17   ;;  %s385_s19 = sadd.s32 4294967294, %s535_s17   ;;  %s535_s17 = sphi %s568_s17, %s16_s17   ;;  %s531_s16 = sphi %s566_s16, %s674_s16   ;;  %s527_s15 = sphi %s564_s15, %s673_s15   ;;  %s523_s14 = sphi %s562_s14, %s672_s14   ;;  %s519_s13 = sphi %s560_s13, %s671_s13   ;;  %s515_s12 = sphi %s558_s12, %s670_s12  }
   0x5   : > { %s25_s20 = sadd.s32 1, %s531_s16  ;;  %s117_s21 = sadd.s32 1, %s523_s14 }
   0x6   : > { %p26_p0 = scmp.ge.s32.totalorder %s25_s20, 2  ;;  %p127_p1 = scmp.ne.s32.totalorder %s523_s14, %s519_s13 }
   0x7   : > { %p128_p2 = scmp.eq.s32.totalorder %s384_s18, 1  ;;  %p133_p3 = scmp.ne.s32.totalorder %s519_s13, %s515_s12 }
   0x8   : > { %s676_s20 = smov (%p26_p0, %s25_s20), 0  ;;  %p134_p5 = scmp.eq.s32.totalorder %s385_s19, 1 }
   0x9   : > { %p598_p4 = por %p128_p2, %p127_p1  ;;  %s112_s23 = ssub.s32 %s531_s16, %s676_s20 }
   0xa   : > { %p390_p6 = scmp.ge.s32.totalorder %s535_s17, 1  ;;  %p115_p7 = scmp.eq.s32.totalorder %s112_s23, 0 }
   0xb   : > { %p605_p8 = por %p134_p5, %p133_p3  ;;  %p176_p9 = scmp.lt.s32.totalorder %s535_s17, 3 }
   0xc   : > { %s611_s25 = scalar_select %p115_p7, %s523_s14, %s117_s21  }
   0xd   : > { %p177_p10 = pnand %p390_p6, %p176_p9 }
   0xe   : > { %p210_p11 = scmp.lt.s32.totalorder (!%p177_p10), %s527_s15, 1  ;;  %s207_s8 = sand.u32 (!%p177_p10), 1, %s519_s13  }
   0xf   : > { %180 = sbr.rel (%p177_p10) target bundleno = 417 (0x1a1), region = 32  ;;  %s391_s9 = sshll.u32 (!%p177_p10), %s207_s8, 2 }
  0x10   : > { %s394_s10 = sshll.u32 (!%p177_p10), %s527_s15, 2  ;;  %s209_s21 = scalar_lea.vmem (!%p177_p10), [#allocation2], %s391_s9 }
  0x11   : > { %s278_s19 = scalar_lea.hbm (!%p177_p10), %s667_s3, %s394_s10  ;;  %s280_s23 = sshll.u32 (!%p177_p10), %s209_s21, 4  ;;  %s281_s23 = int_to_ptr.vmem [resolvable:$true] %s280_s23 }
  0x12   : > { %s477_s4 = scalar_lea.hbm (!%p177_p10), %s667_s3, 8 }
  0x14   : > { %s211_s26 = scalar_select %p210_p11, %s527_s15, 1  ;;  %vm226_vm0 = vcmask 125952   ;;  %v537_v7 = vmov 0   ;;  %v248_v17 = vld [vmem:[%s665_s1] sm:$0xf] }
  0x15   : > { %453 = vset.pattern.permute.xlu1 %v537_v7  ;;  %454 = vset.pattern.permute.xlu0 %v537_v7  ;;  %v249_v21 = vld [vmem:[%s666_s2] sm:$0xf] }
  0x16   : > { %s392_s27 = sshll.u32 %s211_s26, 2  ;;  %s282_s26 = sshll.u32 %s278_s19, 4  ;;  %s283_s26 = int_to_ptr.hbm [resolvable:$true] %s282_s26 }
  0x17   : > { %s216_s30 = scalar_lea.vmem %s664_s0, %s392_s27  ;;  %s267_s27 = scalar_lea.sflag [#allocation3], %s207_s8 }
  0x18   : > { %v225_v0 = vld [vmem:[%s216_s30] sm:$0xf]  ;;  %s471_s28 = sshra.s32 %s283_s26, 4  ;;  %s472_s28 = int_to_ptr.hbm [resolvable:$true] %s471_s28 }
  0x19   : > { %v227_v1 = vsel %vm226_vm0, %v225_v0, 0.0  ;;  %s473_s29 = scalar_lea.hbm %s472_s28, 4  ;;  %p478_p1 = scmp.lt.s32.totalorder %s472_s28, %s667_s3 }
  0x1a   : > { %228 = vadd.xlane.f32.xlu0 %v227_v1  ;;  %p474_p12 = scmp.ne.s32.totalorder %s472_s28, %s473_s29  ;;  %p479_p2 = scmp.lt.s32.totalorder %s477_s4, %s473_s29 }
  0x1c   : > { %p475_p13 = pnand %p474_p12, %p598_p4  ;;  %p480_p3 = por %p479_p2, %p478_p1 }
  0x1e   : > { %p476_p0 = pneg %p475_p13 }
  0x20   : > { %p481_p5 = pnand %p480_p3, %p476_p0 }
  0x8d   : > { %v229_v2 = vpop.xlane.xlu0 %228 }
  0x8e   : > { %v230_v3 = vmul.f32 0.0625, %v229_v2 }
  0x90   : > { %v231_v4 = vsub.f32 %v225_v0, %v230_v3 }
  0x92   : > { %v232_v5 = vmul.f32 %v231_v4, %v231_v4 }
  0x94   : > { %v233_v6 = vsel %vm226_vm0, %v232_v5, 0.0 }
  0x95   : > { %234 = vadd.xlane.f32.xlu0 %v233_v6 }
 0x108   : > { %v235_v8 = vpop.xlane.xlu0 %234 }
 0x109   : > { %v236_v9 = vmul.f32 0.0625, %v235_v8 }
 0x10b   : > { %v237_v10 = vadd.f32 1e-07, %v236_v9 }
 0x10d   : > { %455 = vrsqrt.f32 %v237_v10  ;;  %vm244_vm2 = vweird.f32 %v237_v10 }
 0x113   : > { %v456_v11 = vpop.eup %455 }
 0x114   : > { %v239_v12 = vmul.f32 %v456_v11, %v237_v10  ;;  %vm245_vm1 = vweird.f32 %v456_v11 }
 0x115   : > { %vm246_vm3 = vmor %vm244_vm2, %vm245_vm1 }
 0x116   : > { %v240_v13 = vmul.f32 %v456_v11, %v239_v12 }
 0x118   : > { %v241_v14 = vmul.f32 0.5, %v240_v13 }
 0x11a   : > { %v242_v15 = vsub.f32 1.5, %v241_v14 }
 0x11c   : > { %v243_v16 = vmul.f32 %v456_v11, %v242_v15 }
 0x11e   : > { %v247_v18 = vsel %vm246_vm3, %v456_v11, %v243_v16 }
 0x11f   : > { %v250_v19 = vmul.f32 %v248_v17, %v247_v18 }
 0x121   : > { %255 = vperm.xlu1 %453, %v250_v19   ;;  %v251_v20 = vmul.f32 %v250_v19, %v230_v3 }
 0x123   : > { %v252_v22 = vsub.f32 %v249_v21, %v251_v20 }
 0x129   : > { %261 = vperm.xlu1 %453, %v252_v22  }
 0x193   : > { %v256_v23 = vpop.permute.xlu1 %255 }
 0x194   : > { %v258_v24 = vmul.f32 %v256_v23, %v225_v0 }
 0x19b   : > { %v262_v25 = vpop.permute.xlu1 %261 }
 0x19c   : > { %v264_v26 = vadd.f32 %v262_v25, %v258_v24 }
 0x19e   : > { %265 = vst.msk [vmem:[%s209_s21] sm:$0xf] %vm226_vm0, %v264_v26 }
 0x19f   : > { %484 = shalt.err (!%p481_p5)
}
 0x1a0   : > { %397 = dma.vmem_to_hbm [thread:$0]  (%p598_p4), %s281_s23, 64, %s283_s26, %s267_s27  }
 0x1a1 PF: > { %p403_p6 = scmp.ge.s32.totalorder %s535_s17, 2  ;;  %s294_s7 = sand.u32 1, %s515_s12  }
 0x1a2   : > { %s295_s8 = scalar_lea.sflag [#allocation3], %s294_s7 }
 0x1a3   : > { %p400_p7 = pnand %p403_p6, %p605_p8 }
 0x1a5   : > { %p401_p9 = pneg %p400_p7 }
 0x1a7   : > { %510 = dma.done.wait (%p401_p9), %s295_s8, 64  }
 0x1a8   : > { %512 = vsyncadd (%p401_p9), %s295_s8, 4294967232  ;;  %s16_s17 = sadd.s32 1, %s535_s17   ;;  %s670_s12 = smov %s519_s13 }
 0x1a9   : > { %p13_p10 = scmp.ge.s32.totalorder %s16_s17, 4   ;;  %s671_s13 = smov %s523_s14 }
 0x1aa   : > { %s672_s14 = smov %s611_s25  ;;  %s673_s15 = smov %s531_s16 }
 0x1ab   : > { %s674_s16 = smov %s676_s20  ;;  %15 = sbr.rel (!%p13_p10) target bundleno = 4 (0x4), region = 73 }
 0x1b0   :  { %301 = vsyncpa [#allocation3], 1 }
 0x1b1   :  { %303 = vsyncpa [#allocation3 + $0x1], 1 }

</bundles_post_ra>
